<compile_context>
chip_gen: v7x
topology: tpu7x:2x2x1
jax: 0.10.0
libtpu: 0.0.40
codegen_flags: <defaults>
</compile_context>

<pallas_src>
import functools

import numpy as np
import jax
import jax.numpy as jnp
from jax.experimental import pallas as pl
from jax.experimental.pallas import tpu as pltpu

WINDOW_SIZE = 11
HALF = WINDOW_SIZE // 2          # 5 conv taps per side
HALO = 8                         # sublane-aligned halo rows fetched per side
SIGMA = 1.5
C1 = 0.01 ** 2
C2 = 0.03 ** 2


def _round_up(x, m):
    return ((x + m - 1) // m) * m


def _gaussian_1d(window_size=WINDOW_SIZE, sigma=SIGMA):
    half = window_size // 2
    xs = np.arange(window_size, dtype=np.float64)
    g = np.exp(-((xs - half) ** 2) / (2.0 * sigma ** 2))
    return (g / g.sum()).astype(np.float32)


def _band(n_out, n_in, g, off):
    """band[i, j] = g[j - i - off] inside the 11-tap window, else 0."""
    i = np.arange(n_out)[:, None]
    j = np.arange(n_in)[None, :]
    k = j - i - off
    valid = (k >= 0) & (k < len(g))
    gv = np.asarray(g, np.float32)
    return np.where(valid, gv[np.clip(k, 0, len(g) - 1)], 0.0).astype(np.float32)


def _ssim_kernel(length_ref,
                 xm_ref, xt_ref, xb_ref,
                 ym_ref, yt_ref, yb_ref,
                 bt_ref, bd_ref,
                 out_ref,
                 *, Tt, Dp, D, T, T_pad, has_length):
    # xm/ym: (1, Tt, Dp) main tile.  xt/yt, xb/yb: (1, 8, Dp) top/bottom halos.
    # bt: (Tt, Tt+16) T-axis gaussian band.  bd: (Dp, Dp) D-axis gaussian band.
    # out: (1, 1, 8, 128) lane-dense per-(batch, tile) partial-sum block.
    b = pl.program_id(0)
    t = pl.program_id(1)

    def padded(top_ref, main_ref, bot_ref):
        # (Tt + 16, Dp): [top halo | tile | bottom halo]; padded row j maps to
        # image row t*Tt - HALO + j.  Out-of-image rows are genuine zeros in
        # HBM thanks to the wrapper-side zero padding.
        return jnp.concatenate(
            [top_ref[0], main_ref[0], bot_ref[0]], axis=0).astype(jnp.float32)

    x = padded(xt_ref, xm_ref, xb_ref)
    y = padded(yt_ref, ym_ref, yb_ref)

    if has_length:
        # Fused length masking (applied to inputs before the conv, as in the
        # PyTorch module).  Skipped statically when length is None.
        seq_len = length_ref[b]
        gr = (t * Tt - HALO
              + jax.lax.broadcasted_iota(jnp.int32, (Tt + 2 * HALO, Dp), 0))
        m = (gr < seq_len).astype(jnp.float32)
        x = x * m
        y = y * m

    # Five conv inputs stacked along lanes -> one MXU stream for the T-pass.
    stacked = jnp.concatenate([x, y, x * x, y * y, x * y], axis=1)  # (Tt+16, 5*Dp)
    conv_t = jnp.dot(bt_ref[...], stacked,
                     preferred_element_type=jnp.float32)            # (Tt, 5*Dp)

    # D-pass: dense (Dp, Dp) band matmul.  Fine at Dp = 128; for much larger D
    # the band structure (>=91% zeros) could be exploited with block-tridiag
    # panels, but the MXU is nowhere near the bottleneck here.
    bd = bd_ref[...]

    def dconv(i):
        return jnp.dot(conv_t[:, i * Dp:(i + 1) * Dp], bd,
                       preferred_element_type=jnp.float32)           # (Tt, Dp)

    mu1 = dconv(0)
    mu2 = dconv(1)
    xx_c = dconv(2)
    yy_c = dconv(3)
    xy_c = dconv(4)

    mu1_sq = mu1 * mu1
    mu2_sq = mu2 * mu2
    mu1_mu2 = mu1 * mu2
    sigma1_sq = xx_c - mu1_sq
    sigma2_sq = yy_c - mu2_sq
    sigma12 = xy_c - mu1_mu2

    num = (2.0 * mu1_mu2 + C1) * (2.0 * sigma12 + C2)
    den = (mu1_sq + mu2_sq + C1) * (sigma1_sq + sigma2_sq + C2)

    # EUP approx reciprocal + one Newton step (~f32 exact) instead of a divide.
    inv_den = pl.reciprocal(den, approx=True)
    inv_den = inv_den * (2.0 - den * inv_den)
    ssim_map = num * inv_den

    # Exclude artificial padding from the sum (divisor in the wrapper is B*T*D).
    keep = None
    if T != T_pad:
        row = t * Tt + jax.lax.broadcasted_iota(jnp.int32, (Tt, Dp), 0)
        keep = row < T
    if D != Dp:
        lane = jax.lax.broadcasted_iota(jnp.int32, (Tt, Dp), 1)
        keep = (lane < D) if keep is None else jnp.logical_and(keep, lane < D)
    if keep is not None:
        ssim_map = jnp.where(keep, ssim_map, 0.0)

    out_ref[...] = jnp.full((1, 1, 8, 128), jnp.sum(ssim_map), jnp.float32)


def ssim_loss(y_hat, y, length=None, tile_t=None):
    """Pallas implementation of SSIMLoss.forward. y_hat, y: (B, T, D)."""
    B, T, D = y.shape
    assert y_hat.shape == y.shape

    Dp = _round_up(D, 128)                       # minimal lane padding

    # T-tile selection: ~256 rows by default, multiple of 8, balanced tiles.
    target = 256 if tile_t is None else int(tile_t)
    target = max(8, _round_up(target, 8))
    nT = max(1, (T + target - 1) // target)
    Tt = _round_up((T + nT - 1) // nT, 8)
    T_pad = nT * Tt
    blk8 = Tt // 8

    has_length = length is not None
    if length is None:
        length = jnp.full((B,), T, dtype=jnp.int32)
    length = length.astype(jnp.int32)

    # Zero-pad: one full tile above and below the image (supplies the conv
    # "same" zero halo and keeps every block index in range), pad T up to a
    # multiple of Tt, and lane-pad D up to Dp.  Image lives at rows [Tt, Tt+T).
    pad = ((0, 0), (Tt, (T_pad - T) + Tt), (0, Dp - D))
    y_hat_p = jnp.pad(y_hat, pad)
    y_p = jnp.pad(y, pad)

    g = _gaussian_1d()
    band_t = jnp.asarray(_band(Tt, Tt + 2 * HALO, g, HALO - HALF))   # (Tt, Tt+16)
    band_d = jnp.asarray(_band(Dp, Dp, g, -HALF).T)                  # (Dp, Dp)

    kernel = functools.partial(_ssim_kernel, Tt=Tt, Dp=Dp, D=D, T=T,
                               T_pad=T_pad, has_length=has_length)

    main_spec = pl.BlockSpec((1, Tt, Dp), lambda b, t, ln: (b, t + 1, 0))
    top_spec = pl.BlockSpec((1, 8, Dp),
                            lambda b, t, ln: (b, (t + 1) * blk8 - 1, 0))
    bot_spec = pl.BlockSpec((1, 8, Dp),
                            lambda b, t, ln: (b, (t + 2) * blk8, 0))

    out = pl.pallas_call(
        kernel,
        out_shape=jax.ShapeDtypeStruct((B, nT, 8, 128), jnp.float32),
        grid_spec=pltpu.PrefetchScalarGridSpec(
            num_scalar_prefetch=1,               # `length` -> SMEM
            grid=(B, nT),
            in_specs=[
                main_spec, top_spec, bot_spec,   # y_hat: main, top halo, bottom halo
                main_spec, top_spec, bot_spec,   # y:     main, top halo, bottom halo
                pl.BlockSpec((Tt, Tt + 2 * HALO), lambda b, t, ln: (0, 0)),
                pl.BlockSpec((Dp, Dp), lambda b, t, ln: (0, 0)),
            ],
            out_specs=pl.BlockSpec((1, 1, 8, 128), lambda b, t, ln: (b, t, 0, 0)),
        ),
        compiler_params=pltpu.CompilerParams(
            dimension_semantics=("parallel", "parallel"),
            vmem_limit_bytes=32 * 1024 * 1024,
        ),
    )(length, y_hat_p, y_hat_p, y_hat_p, y_p, y_p, y_p, band_t, band_d)

    ssim_sum = jnp.sum(out[:, :, 0, 0])
    return 1.0 - ssim_sum / (B * T * D)


def _ssim_loss_ref(y_hat, y, length=None):
    """Pure-JAX reference (direct 2-D conv), mirrors the PyTorch code."""
    B, T, D = y.shape
    y_hat = y_hat.astype(jnp.float32)
    y = y.astype(jnp.float32)
    if length is not None:
        mask = (jnp.arange(T)[None, :] < length[:, None]).astype(jnp.float32)
        mask = mask[:, :, None]
        y_hat = y_hat * mask
        y = y * mask
    g = _gaussian_1d()
    w2 = jnp.asarray(np.outer(g, g))[None, None]   # (1,1,11,11) OIHW
    x1 = y_hat[:, None]                            # NCHW, C=1
    x2 = y[:, None]
    half = WINDOW_SIZE // 2

    def conv(img):
        return jax.lax.conv_general_dilated(
            img, w2, (1, 1), [(half, half), (half, half)],
            dimension_numbers=("NCHW", "OIHW", "NCHW"))

    mu1 = conv(x1)
    mu2 = conv(x2)
    mu1_sq, mu2_sq, mu1_mu2 = mu1 * mu1, mu2 * mu2, mu1 * mu2
    s1 = conv(x1 * x1) - mu1_sq
    s2 = conv(x2 * x2) - mu2_sq
    s12 = conv(x1 * x2) - mu1_mu2
    ssim_map = ((2 * mu1_mu2 + C1) * (2 * s12 + C2)) / (
        (mu1_sq + mu2_sq + C1) * (s1 + s2 + C2))
    return 1.0 - jnp.mean(ssim_map)


if __name__ == "__main__":
    key = jax.random.PRNGKey(0)
    k1, k2, k3, k4 = jax.random.split(key, 4)

    # Case 1: length masking + multi-tile T (tile_t=8 -> 2 tiles) + lane padding.
    B, T, D = 2, 16, 16
    y_hat = jax.random.normal(k1, (B, T, D), dtype=jnp.float32)
    y = jax.random.normal(k2, (B, T, D), dtype=jnp.float32)
    length = jnp.array([16, 12], dtype=jnp.int32)
    loss = jax.block_until_ready(ssim_loss(y_hat, y, length, tile_t=8))
    ref = jax.block_until_ready(_ssim_loss_ref(y_hat, y, length))
    np.testing.assert_allclose(np.asarray(loss), np.asarray(ref),
                               rtol=1e-4, atol=1e-4)

    # Case 2: no length mask, T not a multiple of the tile (row masking in sum).
    B, T, D = 2, 20, 16
    y_hat2 = jax.random.normal(k3, (B, T, D), dtype=jnp.float32)
    y2 = jax.random.normal(k4, (B, T, D), dtype=jnp.float32)
    loss2 = jax.block_until_ready(ssim_loss(y_hat2, y2, None, tile_t=8))
    ref2 = jax.block_until_ready(_ssim_loss_ref(y_hat2, y2, None))
    np.testing.assert_allclose(np.asarray(loss2), np.asarray(ref2),
                               rtol=1e-4, atol=1e-4)

    # Case 3: default (single-tile) path.
    loss3 = jax.block_until_ready(ssim_loss(y_hat, y, length))
    np.testing.assert_allclose(np.asarray(loss3), np.asarray(ref),
                               rtol=1e-4, atol=1e-4)

    print("KERNEL_OK")
</pallas_src>

<mosaic_0001>
module attributes {stable_mosaic.version = 11 : i64} {
  func.func @_ssim_kernel(%arg0: i32, %arg1: i32, %arg2: memref<2xi32, #tpu.memory_space<smem>>, %arg3: memref<1x8x128xf32, #tpu.memory_space<vmem>>, %arg4: memref<1x8x128xf32, #tpu.memory_space<vmem>>, %arg5: memref<1x8x128xf32, #tpu.memory_space<vmem>>, %arg6: memref<1x8x128xf32, #tpu.memory_space<vmem>>, %arg7: memref<1x8x128xf32, #tpu.memory_space<vmem>>, %arg8: memref<1x8x128xf32, #tpu.memory_space<vmem>>, %arg9: memref<8x24xf32, #tpu.memory_space<vmem>>, %arg10: memref<128x128xf32, #tpu.memory_space<vmem>>, %arg11: memref<1x1x8x128xf32, #tpu.memory_space<vmem>>) attributes {dimension_semantics = [#tpu.dimension_semantics<parallel>, #tpu.dimension_semantics<parallel>], iteration_bounds = array<i64: 2, 2>, scalar_prefetch = 1 : i64, scratch_operands = 0 : i64, tpu.core_type = #tpu.core_type<tc>, window_params = [{transform_indices = @transform_0, window_bounds = array<i64: 1, 8, 128>}, {transform_indices = @transform_1, window_bounds = array<i64: 1, 8, 128>}, {transform_indices = @transform_2, window_bounds = array<i64: 1, 8, 128>}, {transform_indices = @transform_3, window_bounds = array<i64: 1, 8, 128>}, {transform_indices = @transform_4, window_bounds = array<i64: 1, 8, 128>}, {transform_indices = @transform_5, window_bounds = array<i64: 1, 8, 128>}, {pipeline_mode = #tpu.pipeline_mode<synchronous>, transform_indices = @transform_6, window_bounds = array<i64: 8, 24>}, {pipeline_mode = #tpu.pipeline_mode<synchronous>, transform_indices = @transform_7, window_bounds = array<i64: 128, 128>}, {transform_indices = @transform_8, window_bounds = array<i64: 1, 1, 8, 128>}]} {
    %c0 = arith.constant 0 : index
    %c0_0 = arith.constant 0 : index
    %c0_1 = arith.constant 0 : index
    %0 = vector.load %arg4[%c0, %c0_0, %c0_1] : memref<1x8x128xf32, #tpu.memory_space<vmem>>, vector<1x8x128xf32>
    %1 = vector.shape_cast %0 : vector<1x8x128xf32> to vector<8x128xf32>
    %c0_2 = arith.constant 0 : index
    %c0_3 = arith.constant 0 : index
    %c0_4 = arith.constant 0 : index
    %2 = vector.load %arg3[%c0_2, %c0_3, %c0_4] : memref<1x8x128xf32, #tpu.memory_space<vmem>>, vector<1x8x128xf32>
    %3 = vector.shape_cast %2 : vector<1x8x128xf32> to vector<8x128xf32>
    %c0_5 = arith.constant 0 : index
    %c0_6 = arith.constant 0 : index
    %c0_7 = arith.constant 0 : index
    %4 = vector.load %arg5[%c0_5, %c0_6, %c0_7] : memref<1x8x128xf32, #tpu.memory_space<vmem>>, vector<1x8x128xf32>
    %5 = vector.shape_cast %4 : vector<1x8x128xf32> to vector<8x128xf32>
    %6 = tpu.concatenate %1, %3, %5 in 0 : vector<8x128xf32>, vector<8x128xf32>, vector<8x128xf32> -> vector<24x128xf32>
    %c0_8 = arith.constant 0 : index
    %c0_9 = arith.constant 0 : index
    %c0_10 = arith.constant 0 : index
    %7 = vector.load %arg7[%c0_8, %c0_9, %c0_10] : memref<1x8x128xf32, #tpu.memory_space<vmem>>, vector<1x8x128xf32>
    %8 = vector.shape_cast %7 : vector<1x8x128xf32> to vector<8x128xf32>
    %c0_11 = arith.constant 0 : index
    %c0_12 = arith.constant 0 : index
    %c0_13 = arith.constant 0 : index
    %9 = vector.load %arg6[%c0_11, %c0_12, %c0_13] : memref<1x8x128xf32, #tpu.memory_space<vmem>>, vector<1x8x128xf32>
    %10 = vector.shape_cast %9 : vector<1x8x128xf32> to vector<8x128xf32>
    %c0_14 = arith.constant 0 : index
    %c0_15 = arith.constant 0 : index
    %c0_16 = arith.constant 0 : index
    %11 = vector.load %arg8[%c0_14, %c0_15, %c0_16] : memref<1x8x128xf32, #tpu.memory_space<vmem>>, vector<1x8x128xf32>
    %12 = vector.shape_cast %11 : vector<1x8x128xf32> to vector<8x128xf32>
    %13 = tpu.concatenate %8, %10, %12 in 0 : vector<8x128xf32>, vector<8x128xf32>, vector<8x128xf32> -> vector<24x128xf32>
    %14 = arith.index_cast %arg0 : i32 to index
    %15 = memref.load %arg2[%14] : memref<2xi32, #tpu.memory_space<smem>>
    %c8_i32 = arith.constant 8 : i32
    %16 = arith.muli %arg1, %c8_i32 : i32
    %c8_i32_17 = arith.constant 8 : i32
    %17 = arith.subi %16, %c8_i32_17 : i32
    %18 = tpu.iota {dimensions = array<i32: 0>} : vector<24x128xi32>
    %19 = vector.broadcast %17 : i32 to vector<24x128xi32>
    %20 = arith.addi %19, %18 : vector<24x128xi32>
    %21 = vector.broadcast %15 : i32 to vector<24x128xi32>
    %22 = arith.cmpi slt, %20, %21 : vector<24x128xi32>
    %23 = arith.extui %22 : vector<24x128xi1> to vector<24x128xi32>
    %24 = arith.sitofp %23 : vector<24x128xi32> to vector<24x128xf32>
    %25 = arith.mulf %6, %24 : vector<24x128xf32>
    %26 = arith.mulf %13, %24 : vector<24x128xf32>
    %27 = arith.mulf %25, %25 : vector<24x128xf32>
    %28 = arith.mulf %26, %26 : vector<24x128xf32>
    %29 = arith.mulf %25, %26 : vector<24x128xf32>
    %30 = tpu.concatenate %25, %26, %27, %28, %29 in 1 : vector<24x128xf32>, vector<24x128xf32>, vector<24x128xf32>, vector<24x128xf32>, vector<24x128xf32> -> vector<24x640xf32>
    %c0_18 = arith.constant 0 : index
    %c0_19 = arith.constant 0 : index
    %31 = vector.load %arg9[%c0_18, %c0_19] : memref<8x24xf32, #tpu.memory_space<vmem>>, vector<8x24xf32>
    %cst = arith.constant dense<0.000000e+00> : vector<8x640xf32>
    %32 = tpu.matmul %31, %30, %cst {dimension_numbers = #tpu.dot_dimension_numbers<[1], [0], [0], [1], [0, 0, 1, 1], [], []>} : vector<8x24xf32>, vector<24x640xf32>, vector<8x640xf32> -> vector<8x640xf32>
    %c0_20 = arith.constant 0 : index
    %c0_21 = arith.constant 0 : index
    %33 = vector.load %arg10[%c0_20, %c0_21] : memref<128x128xf32, #tpu.memory_space<vmem>>, vector<128x128xf32>
    %34 = vector.extract_strided_slice %32 {offsets = [0, 0], sizes = [8, 128], strides = [1, 1]} : vector<8x640xf32> to vector<8x128xf32>
    %cst_22 = arith.constant dense<0.000000e+00> : vector<8x128xf32>
    %35 = tpu.matmul %34, %33, %cst_22 {dimension_numbers = #tpu.dot_dimension_numbers<[1], [0], [0], [1], [0, 0, 1, 1], [], []>} : vector<8x128xf32>, vector<128x128xf32>, vector<8x128xf32> -> vector<8x128xf32>
    %36 = vector.extract_strided_slice %32 {offsets = [0, 128], sizes = [8, 128], strides = [1, 1]} : vector<8x640xf32> to vector<8x128xf32>
    %cst_23 = arith.constant dense<0.000000e+00> : vector<8x128xf32>
    %37 = tpu.matmul %36, %33, %cst_23 {dimension_numbers = #tpu.dot_dimension_numbers<[1], [0], [0], [1], [0, 0, 1, 1], [], []>} : vector<8x128xf32>, vector<128x128xf32>, vector<8x128xf32> -> vector<8x128xf32>
    %38 = vector.extract_strided_slice %32 {offsets = [0, 256], sizes = [8, 128], strides = [1, 1]} : vector<8x640xf32> to vector<8x128xf32>
    %cst_24 = arith.constant dense<0.000000e+00> : vector<8x128xf32>
    %39 = tpu.matmul %38, %33, %cst_24 {dimension_numbers = #tpu.dot_dimension_numbers<[1], [0], [0], [1], [0, 0, 1, 1], [], []>} : vector<8x128xf32>, vector<128x128xf32>, vector<8x128xf32> -> vector<8x128xf32>
    %40 = vector.extract_strided_slice %32 {offsets = [0, 384], sizes = [8, 128], strides = [1, 1]} : vector<8x640xf32> to vector<8x128xf32>
    %cst_25 = arith.constant dense<0.000000e+00> : vector<8x128xf32>
    %41 = tpu.matmul %40, %33, %cst_25 {dimension_numbers = #tpu.dot_dimension_numbers<[1], [0], [0], [1], [0, 0, 1, 1], [], []>} : vector<8x128xf32>, vector<128x128xf32>, vector<8x128xf32> -> vector<8x128xf32>
    %42 = vector.extract_strided_slice %32 {offsets = [0, 512], sizes = [8, 128], strides = [1, 1]} : vector<8x640xf32> to vector<8x128xf32>
    %cst_26 = arith.constant dense<0.000000e+00> : vector<8x128xf32>
    %43 = tpu.matmul %42, %33, %cst_26 {dimension_numbers = #tpu.dot_dimension_numbers<[1], [0], [0], [1], [0, 0, 1, 1], [], []>} : vector<8x128xf32>, vector<128x128xf32>, vector<8x128xf32> -> vector<8x128xf32>
    %44 = arith.mulf %35, %35 : vector<8x128xf32>
    %45 = arith.mulf %37, %37 : vector<8x128xf32>
    %46 = arith.mulf %35, %37 : vector<8x128xf32>
    %47 = arith.subf %39, %44 : vector<8x128xf32>
    %48 = arith.subf %41, %45 : vector<8x128xf32>
    %49 = arith.subf %43, %46 : vector<8x128xf32>
    %cst_27 = arith.constant 2.000000e+00 : f32
    %50 = vector.broadcast %cst_27 : f32 to vector<8x128xf32>
    %51 = arith.mulf %50, %46 : vector<8x128xf32>
    %cst_28 = arith.constant 9.99999974E-5 : f32
    %52 = vector.broadcast %cst_28 : f32 to vector<8x128xf32>
    %53 = arith.addf %51, %52 : vector<8x128xf32>
    %cst_29 = arith.constant 2.000000e+00 : f32
    %54 = vector.broadcast %cst_29 : f32 to vector<8x128xf32>
    %55 = arith.mulf %54, %49 : vector<8x128xf32>
    %cst_30 = arith.constant 8.99999984E-4 : f32
    %56 = vector.broadcast %cst_30 : f32 to vector<8x128xf32>
    %57 = arith.addf %55, %56 : vector<8x128xf32>
    %58 = arith.mulf %53, %57 : vector<8x128xf32>
    %59 = arith.addf %44, %45 : vector<8x128xf32>
    %cst_31 = arith.constant 9.99999974E-5 : f32
    %60 = vector.broadcast %cst_31 : f32 to vector<8x128xf32>
    %61 = arith.addf %59, %60 : vector<8x128xf32>
    %62 = arith.addf %47, %48 : vector<8x128xf32>
    %cst_32 = arith.constant 8.99999984E-4 : f32
    %63 = vector.broadcast %cst_32 : f32 to vector<8x128xf32>
    %64 = arith.addf %62, %63 : vector<8x128xf32>
    %65 = arith.mulf %61, %64 : vector<8x128xf32>
    %66 = tpu.reciprocal %65 {approx = true} : vector<8x128xf32> -> vector<8x128xf32>
    %67 = arith.mulf %65, %66 : vector<8x128xf32>
    %cst_33 = arith.constant 2.000000e+00 : f32
    %68 = vector.broadcast %cst_33 : f32 to vector<8x128xf32>
    %69 = arith.subf %68, %67 : vector<8x128xf32>
    %70 = arith.mulf %66, %69 : vector<8x128xf32>
    %71 = arith.mulf %58, %70 : vector<8x128xf32>
    %72 = tpu.iota {dimensions = array<i32: 1>} : vector<8x128xi32>
    %c16_i32 = arith.constant 16 : i32
    %73 = vector.broadcast %c16_i32 : i32 to vector<8x128xi32>
    %74 = arith.cmpi slt, %72, %73 : vector<8x128xi32>
    %cst_34 = arith.constant 0.000000e+00 : f32
    %75 = vector.broadcast %cst_34 : f32 to vector<8x128xf32>
    %76 = arith.select %74, %71, %75 : vector<8x128xi1>, vector<8x128xf32>
    %77 = vector.shape_cast %76 : vector<8x128xf32> to vector<1x8x128xf32>
    %cst_35 = arith.constant dense<0.000000e+00> : vector<1xf32>
    %78 = vector.multi_reduction <add>, %77, %cst_35 [1, 2] : vector<1x8x128xf32> to vector<1xf32>
    %79 = vector.shape_cast %78 : vector<1xf32> to vector<1x1x1xf32>
    %80 = vector.extract %79[0, 0, 0] : f32 from vector<1x1x1xf32>
    %81 = vector.broadcast %80 : f32 to vector<1x1x8x128xf32>
    %c0_36 = arith.constant 0 : index
    %c0_37 = arith.constant 0 : index
    %c0_38 = arith.constant 0 : index
    %c0_39 = arith.constant 0 : index
    %82 = vector.load %arg11[%c0_36, %c0_37, %c0_38, %c0_39] : memref<1x1x8x128xf32, #tpu.memory_space<vmem>>, vector<1x1x8x128xf32>
    tpu.vector_store %arg11[%c0_36, %c0_37, %c0_38, %c0_39], %81 {strides = array<i32>} : memref<1x1x8x128xf32, #tpu.memory_space<vmem>>, vector<1x1x8x128xf32>,
    return
  }
  func.func @transform_0(%arg0: i32, %arg1: i32, %arg2: memref<2xi32, #tpu.memory_space<smem>>) -> (i32, i32, i32) {
    %c1_i32 = arith.constant 1 : i32
    %0 = arith.addi %arg1, %c1_i32 : i32
    %c0_i32 = arith.constant 0 : i32
    %c0_i32_0 = arith.constant 0 : i32
    return %arg0, %0, %c0_i32 : i32, i32, i32
  }
  func.func @transform_1(%arg0: i32, %arg1: i32, %arg2: memref<2xi32, #tpu.memory_space<smem>>) -> (i32, i32, i32) {
    %c1_i32 = arith.constant 1 : i32
    %0 = arith.addi %arg1, %c1_i32 : i32
    %c1_i32_0 = arith.constant 1 : i32
    %1 = arith.muli %0, %c1_i32_0 : i32
    %c1_i32_1 = arith.constant 1 : i32
    %2 = arith.subi %1, %c1_i32_1 : i32
    %c0_i32 = arith.constant 0 : i32
    %c0_i32_2 = arith.constant 0 : i32
    return %arg0, %2, %c0_i32 : i32, i32, i32
  }
  func.func @transform_2(%arg0: i32, %arg1: i32, %arg2: memref<2xi32, #tpu.memory_space<smem>>) -> (i32, i32, i32) {
    %c2_i32 = arith.constant 2 : i32
    %0 = arith.addi %arg1, %c2_i32 : i32
    %c1_i32 = arith.constant 1 : i32
    %1 = arith.muli %0, %c1_i32 : i32
    %c0_i32 = arith.constant 0 : i32
    %c0_i32_0 = arith.constant 0 : i32
    return %arg0, %1, %c0_i32 : i32, i32, i32
  }
  func.func @transform_3(%arg0: i32, %arg1: i32, %arg2: memref<2xi32, #tpu.memory_space<smem>>) -> (i32, i32, i32) {
    %c1_i32 = arith.constant 1 : i32
    %0 = arith.addi %arg1, %c1_i32 : i32
    %c0_i32 = arith.constant 0 : i32
    %c0_i32_0 = arith.constant 0 : i32
    return %arg0, %0, %c0_i32 : i32, i32, i32
  }
  func.func @transform_4(%arg0: i32, %arg1: i32, %arg2: memref<2xi32, #tpu.memory_space<smem>>) -> (i32, i32, i32) {
    %c1_i32 = arith.constant 1 : i32
    %0 = arith.addi %arg1, %c1_i32 : i32
    %c1_i32_0 = arith.constant 1 : i32
    %1 = arith.muli %0, %c1_i32_0 : i32
    %c1_i32_1 = arith.constant 1 : i32
    %2 = arith.subi %1, %c1_i32_1 : i32
    %c0_i32 = arith.constant 0 : i32
    %c0_i32_2 = arith.constant 0 : i32
    return %arg0, %2, %c0_i32 : i32, i32, i32
  }
  func.func @transform_5(%arg0: i32, %arg1: i32, %arg2: memref<2xi32, #tpu.memory_space<smem>>) -> (i32, i32, i32) {
    %c2_i32 = arith.constant 2 : i32
    %0 = arith.addi %arg1, %c2_i32 : i32
    %c1_i32 = arith.constant 1 : i32
    %1 = arith.muli %0, %c1_i32 : i32
    %c0_i32 = arith.constant 0 : i32
    %c0_i32_0 = arith.constant 0 : i32
    return %arg0, %1, %c0_i32 : i32, i32, i32
  }
  func.func @transform_6(%arg0: i32, %arg1: i32, %arg2: memref<2xi32, #tpu.memory_space<smem>>) -> (i32, i32) {
    %c0_i32 = arith.constant 0 : i32
    %c0_i32_0 = arith.constant 0 : i32
    %c0_i32_1 = arith.constant 0 : i32
    return %c0_i32, %c0_i32_0 : i32, i32
  }
  func.func @transform_7(%arg0: i32, %arg1: i32, %arg2: memref<2xi32, #tpu.memory_space<smem>>) -> (i32, i32) {
    %c0_i32 = arith.constant 0 : i32
    %c0_i32_0 = arith.constant 0 : i32
    %c0_i32_1 = arith.constant 0 : i32
    return %c0_i32, %c0_i32_0 : i32, i32
  }
  func.func @transform_8(%arg0: i32, %arg1: i32, %arg2: memref<2xi32, #tpu.memory_space<smem>>) -> (i32, i32, i32, i32) {
    %c0_i32 = arith.constant 0 : i32
    %c0_i32_0 = arith.constant 0 : i32
    %c0_i32_1 = arith.constant 0 : i32
    return %arg0, %arg1, %c0_i32, %c0_i32_0 : i32, i32, i32, i32
  }
}

</mosaic_0001>

<bundles_post_ra>
// kernel: tpu_custom_call.1
= control target key start
LH: loop header
LB: loop body
LE: loop exit
PB: predicated region body
PF: predicated region fallthrough
CT: control target
= control target key end

     0   :  { %s3253_s0 = inlined_call_operand.hbm [shape: s32[2], index: 0, kind: input, shape index: {}]   ;;  %s3254_s1 = inlined_call_operand.hbm [shape: f32[2,32,128], index: 1, kind: input, shape index: {}]   ;;  %s3255_s2 = inlined_call_operand.hbm [shape: f32[2,32,128], index: 2, kind: input, shape index: {}]   ;;  %s3256_s3 = inlined_call_operand.hbm [shape: f32[2,32,128], index: 3, kind: input, shape index: {}]   ;;  %s3257_s4 = inlined_call_operand.hbm [shape: f32[2,32,128], index: 4, kind: input, shape index: {}]   ;;  %s3258_s5 = inlined_call_operand.hbm [shape: f32[2,32,128], index: 5, kind: input, shape index: {}]   ;;  %s3259_s6 = inlined_call_operand.hbm [shape: f32[2,32,128], index: 6, kind: input, shape index: {}]   ;;  %s3260_s7 = inlined_call_operand.vmem [shape: f32[8,24], index: 7, kind: input, shape index: {}]   ;;  %s3261_s8 = inlined_call_operand.hbm [shape: f32[128,128], index: 8, kind: input, shape index: {}]   ;;  %s3262_s9 = inlined_call_operand.hbm [shape: f32[2,2,8,128], index: 9, kind: output, shape index: {}]  }
   0x1   :  { %3295 = sst [smem:[#allocation39_spill]] %s3254_s1  ;;  %s2088_s11 = scalar_lea.hbm %s3253_s0, 16 }
   0x2   :  { %3296 = sst [smem:[#allocation40_spill]] %s3255_s2  ;;  %p2089_p0 = scmp.ne.s32.totalorder %s3253_s0, %s2088_s11 }
   0x3   :  { %3297 = sst [smem:[#allocation41_spill]] %s3257_s4  ;;  %p2092_p1 = scmp.lt.u32.totalorder %s2088_s11, %s3253_s0 }
   0x4   :  { %3298 = sst [smem:[#allocation42_spill]] %s3258_s5 }
   0x5   :  { %3299 = sst [smem:[#allocation43_spill]] %s3259_s6  ;;  %p2094_p2 = pnand %p2092_p1, %p2089_p0 }
   0x6   :  { %3300 = sst [smem:[#allocation44_spill]] %s3260_s7 }
   0x7   :  { %3301 = sst [smem:[#allocation45_spill]] %s3261_s8 }
   0x8   :  { %3302 = sst [smem:[#allocation46_spill]] %s3262_s9 }
   0x9   :  { %2097 = shalt.err (!%p2094_p2)  }
   0xa   :  { %s2484_s16 = smov [#allocation3]  }
   0xb   :  { %15 = dma.hbm_to_smem %s3253_s0, 16, %s2484_s16, [#allocation2] }
   0xc   :  { %2394 = dma.done.wait [#allocation2], 16 }
   0xd   :  { %2395 = vsyncadd [#allocation2], 4294967280 }
   0xe   :  { %17 = sfence }
   0xf   :  { %18 = vsyncpa [#allocation5], 0 }
  0x10   :  { %20 = vsyncpa [#allocation5 + $0x1], 0 }
  0x11   :  { %21 = vsyncpa [#allocation8], 0 }
  0x12   :  { %23 = vsyncpa [#allocation8 + $0x1], 0 }
  0x13   :  { %24 = vsyncpa [#allocation11], 0 }
  0x14   :  { %26 = vsyncpa [#allocation11 + $0x1], 0 }
  0x15   :  { %27 = vsyncpa [#allocation14], 0 }
  0x16   :  { %29 = vsyncpa [#allocation14 + $0x1], 0 }
  0x17   :  { %30 = vsyncpa [#allocation6], 0 }
  0x18   :  { %32 = vsyncpa [#allocation6 + $0x1], 0  ;;  %s2560_s19 = smov 0   ;;  %s2562_s20 = smov 0  }
  0x19   :  { %s2564_s21 = smov 0   ;;  %s2566_s0 = smov 0  }
  0x1a   :  { %s2568_s22 = smov 0   ;;  %s2570_s23 = smov 0  }
  0x1b   :  { %s2572_s24 = smov 0   ;;  %s2574_s25 = smov 0  }
  0x1c   :  { %s2576_s26 = smov 0   ;;  %s2578_s27 = smov 0  }
  0x1d   :  { %s2580_s28 = smov 0   ;;  %s2582_s29 = smov 0  }
  0x1e   :  { %s2584_s30 = smov 0   ;;  %s2586_s10 = smov 0  }
  0x1f LB: > { %3303 = sst [smem:[#allocation26_spill]] %s2442_s0  ;;  %s2631_s11 = sadd.s32 4294967295, %s2482_s10   ;;  %s2482_s10 = sphi %s2586_s10, %s38_s10   ;;  %s2478_s30 = sphi %s2584_s30, %s3382_s30   ;;  %s2474_s29 = sphi %s2582_s29, %s3381_s29   ;;  %s2470_s28 = sphi %s2580_s28, %s3371_s28   ;;  %s2466_s27 = sphi %s2578_s27, %s3380_s27   ;;  %s2462_s26 = sphi %s2576_s26, %s3379_s26   ;;  %s2458_s25 = sphi %s2574_s25, %s3378_s25   ;;  %s2454_s24 = sphi %s2572_s24, %s3377_s24   ;;  %s2450_s23 = sphi %s2570_s23, %s3369_s23   ;;  %s2446_s22 = sphi %s2568_s22, %s3368_s22   ;;  %s2442_s0 = sphi %s2566_s0, %s3367_s0   ;;  %s2438_s21 = sphi %s2564_s21, %s3376_s21   ;;  %s2434_s20 = sphi %s2562_s20, %s3375_s20   ;;  %s2430_s19 = sphi %s2560_s19, %s3374_s19  }
  0x20   : > { %3304 = sst [smem:[#allocation27_spill]] %s2446_s22  ;;  %p1469_p3 = scmp.ge.s32.totalorder %s2482_s10, 1 }
  0x21   : > { %3305 = sst [smem:[#allocation28_spill]] %s2450_s23  ;;  %p3266_p4 = scmp.eq.s32.totalorder %s2631_s11, 0 }
  0x22   : > { %3306 = sst [smem:[#allocation29_spill]] %s2466_s27  ;;  %p301_p5 = scmp.lt.s32.totalorder %s2482_s10, 5 }
  0x23   : > { %3307 = sst [smem:[#allocation30_spill]] %s2470_s28  ;;  %s2485_s13 = smov [#allocation15]  }
  0x24   : > { %3308 = sst [smem:[#allocation31_spill]] %s2478_s30  ;;  %p2636_p6 = pnand %p1469_p3, %p301_p5 }
  0x25   : > { %s316_s14 = sshll.u32 %s2485_s13, 4  ;;  %s3312_s8 = sld [smem:[#allocation45_spill]]  ;;  %s317_s14 = int_to_ptr.vmem [resolvable:$true] %s316_s14 }
  0x26   : > { %s3309_s12 = scalar_select %p2636_p6, 1, 0 }
  0x27   : > { %p1936_p7 = pneg %p2636_p6 }
  0x28   : > { %3310 = sst [smem:[#allocation32_spill]] %s3309_s12 }
  0x29   : > { %p2644_p8 = pnand %p1936_p7, %p3266_p4 }
  0x2b   : > { %s2098_s18 = scalar_lea.hbm %s3312_s8, 2048  ;;  %p2100_p10 = pneg %p2644_p8 }
  0x2c   : > { %p2099_p9 = scmp.ne.s32.totalorder %s3312_s8, %s2098_s18  ;;  %p2105_p13 = scmp.lt.u32.totalorder %s2098_s18, %s3312_s8 }
  0x2e   : > { %p2101_p11 = pnand %p2100_p10, %p2099_p9 }
  0x30   : > { %p2102_p12 = pneg %p2101_p11 }
  0x32   : > { %p2107_p0 = pnand %p2105_p13, %p2102_p12 }
  0x34   : > { %2110 = shalt.err (!%p2107_p0)
}
  0x35   : > { %s2111_s27 = scalar_lea.vmem %s317_s14, 2048  ;;  %p2119_p5 = scmp.lt.s32.totalorder %s317_s14, %s317_s14 }
  0x36   : > { %p2112_p1 = scmp.ne.s32.totalorder %s317_s14, %s2111_s27  ;;  %p2120_p7 = scmp.lt.s32.totalorder %s2111_s27, %s2111_s27 }
  0x38   : > { %p2114_p2 = pnand %p2112_p1, %p2100_p10  ;;  %p2121_p4 = por %p2120_p7, %p2119_p5 }
  0x3a   : > { %p2115_p3 = pneg %p2114_p2 }
  0x3c   : > { %p2122_p6 = pnand %p2121_p4, %p2115_p3 }
  0x3e   : > { %2125 = shalt.err (!%p2122_p6)
}
  0x3f   : > { %s2486_s7 = smov 128   ;;  %s2487_s9 = smov 8  }
  0x40   : > { %1939 = dma.hbm_to_vmem [thread:$0]  (!%p2644_p8), %s3312_s8, 2048, %s317_s14, [#allocation14], %s2486_s7, %s2486_s7, %s2487_s9  }
  0x41   : > { %s1468_s16 = sadd.s32 4294967294, %s2482_s10   ;;  %s2666_s17 = sadd.s32 1, %s2474_s29 }
  0x42   : > { %s50_s18 = sadd.s32 1, %s2478_s30  ;;  %p48_p4 = scmp.ge.s32.totalorder %s2666_s17, 2 }
  0x43   : > { %p3282_p6 = scmp.eq.s32.totalorder %s2482_s10, 0  ;;  %s89_s13 = sadd.s32 1, %s2450_s23 }
  0x44   : > { %p96_p9 = scmp.ne.s32.totalorder %s2450_s23, %s2446_s22  ;;  %s3384_s18 = smov (!%p48_p4, %s50_s18), %s2478_s30 }
  0x45   : > { %s2675_s12 = scalar_select %p48_p4, 0, %s2666_s17  }
  0x46   : > { %p2682_p8 = por %p96_p9, %p3282_p6  ;;  %p52_p10 = scmp.ge.s32.totalorder %s3384_s18, 2 }
  0x47   : > { %s85_s15 = ssub.s32 %s2474_s29, %s2675_s12  ;;  %p102_p11 = scmp.ne.s32.totalorder %s2446_s22, %s2442_s0 }
  0x48   : > { %p288_p12 = scmp.eq.s32.totalorder %s2631_s11, 3  ;;  %s3386_s18 = smov (%p52_p10, %s3384_s18), 0 }
  0x49   : > { %3314 = sst [smem:[#allocation33_spill]] %s3386_s18  ;;  %p3315_p13 = scmp.eq.s32.totalorder %s2631_s11, 0 }
  0x4a   : > { %p2698_p1 = por %p288_p12, %p96_p9  ;;  %s2704_s28 = ssub.s32 %s2478_s30, %s3386_s18 }
  0x4b   : > { %p2694_p0 = por %p102_p11, %p3315_p13  ;;  %p294_p2 = scmp.eq.s32.totalorder %s1468_s16, 3 }
  0x4c   : > { %s3318_s27 = scalar_select %p2698_p1, 1, 0 }
  0x4d   : > { %s3316_s9 = scalar_select %p2694_p0, 1, 0 }
  0x4e   : > { %3319 = sst [smem:[#allocation35_spill]] %s3318_s27  ;;  %s86_s7 = sor.u32 %s85_s15, %s2704_s28 }
  0x4f   : > { %3317 = sst [smem:[#allocation34_spill]] %s3316_s9  ;;  %p3281_p3 = scmp.lt.s32.totalorder %s2482_s10, 4 }
  0x50   : > { %p87_p5 = scmp.eq.s32.totalorder %s86_s7, 0  ;;  %p2708_p7 = por %p294_p2, %p102_p11 }
  0x51   : > { %s1473_s0 = sshll.u32 %s2478_s30, 2  ;;  %s2714_s22 = sand.u32 1, %s2482_s10  }
  0x52   : > { %s3320_s8 = scalar_select %p2708_p7, 1, 0 }
  0x53   : > { %s2717_s9 = scalar_select %p87_p5, %s2450_s23, %s89_s13  }
  0x54   : > { %3321 = sst [smem:[#allocation36_spill]] %s3320_s8  ;;  %s1287_s6 = sadd.s32 %s2474_s29, %s1473_s0 }
  0x55   : > { %3322 = sst [smem:[#allocation37_spill]] %s2717_s9  ;;  %s2720_s5 = sshll.u32 %s1287_s6, 7 }
  0x56   : > { %s353_s18 = sand.u32 1, %s2450_s23   ;;  %s3323_s2 = sld [smem:[#allocation40_spill]] }
  0x57   : > { %s2723_s27 = sshll.u32 %s353_s18, 3  ;;  %p2735_p4 = pnand %p3281_p3, %p2682_p8 }
  0x58   : > { %s355_s6 = scalar_lea.vmem [#allocation7], %s2723_s27  ;;  %s3284_s13 = scalar_lea.sflag [#allocation8], %s2714_s22 }
  0x59   : > { %s3324_s0 = scalar_select %p2735_p4, 1, 0 }
  0x5a   : > { %s364_s18 = sshll.u32 %s355_s6, 4  ;;  %p3287_p10 = pneg %p2735_p4  ;;  %s2740_s18 = int_to_ptr.vmem [resolvable:$true] %s364_s18 }
  0x5c   : > { %s2729_s7 = scalar_lea.hbm %s3323_s2, %s2720_s5  ;;  %s2131_s30 = scalar_lea.hbm %s3323_s2, 1024 }
  0x5d   : > { %s2126_s16 = scalar_lea.hbm %s2729_s7, 128  ;;  %p2132_p8 = scmp.lt.u32.totalorder %s2729_s7, %s3323_s2 }
  0x5e   : > { %p2127_p9 = scmp.ne.s32.totalorder %s2729_s7, %s2126_s16  ;;  %p2133_p13 = scmp.lt.u32.totalorder %s2131_s30, %s2126_s16 }
  0x5f   : > { %p2135_p5 = scmp.lt.u32.totalorder %s2126_s16, %s2729_s7 }
  0x60   : > { %p2129_p11 = pnand %p3287_p10, %p2127_p9  ;;  %p2134_p2 = por %p2133_p13, %p2132_p8 }
  0x62   : > { %p2130_p12 = pneg %p2129_p11  ;;  %p2136_p3 = por %p2135_p5, %p2134_p2 }
  0x64   : > { %p2137_p6 = pnand %p2136_p3, %p2130_p12 }
  0x66   : > { %2140 = shalt.err (!%p2137_p6)
}
  0x67   : > { %s2141_s6 = scalar_lea.vmem %s2740_s18, 128  ;;  %s2488_s14 = smov [#allocation7]  }
  0x68   : > { %p2142_p9 = scmp.ne.s32.totalorder %s2740_s18, %s2141_s6  ;;  %s2146_s15 = sshll.u32 %s2488_s14, 4  ;;  %s2147_s15 = int_to_ptr.vmem [resolvable:$false] %s2146_s15 }
  0x69   : > { %s2148_s23 = scalar_lea.vmem %s2147_s15, 256  ;;  %p2149_p1 = scmp.lt.s32.totalorder %s2740_s18, %s2147_s15 }
  0x6a   : > { %p2144_p11 = pnand %p2142_p9, %p3287_p10  ;;  %p2150_p8 = scmp.lt.s32.totalorder %s2148_s23, %s2141_s6 }
  0x6c   : > { %p2145_p7 = pneg %p2144_p11  ;;  %p2151_p13 = por %p2150_p8, %p2149_p1 }
  0x6e   : > { %p2152_p2 = pnand %p2151_p13, %p2145_p7 }
  0x70   : > { %2155 = shalt.err (!%p2152_p2)
}
  0x71   : > { %1946 = dma.hbm_to_vmem [thread:$0]  (!%p2735_p4), %s2729_s7, 128, %s2740_s18, %s3284_s13  }
  0x72   : > { %s55_s30 = sadd.s32 1, %s2675_s12  ;;  %s61_s9 = sadd.s32 1, %s2462_s26 }
  0x73   : > { %s57_s16 = ssub.s32 %s2666_s17, %s55_s30  ;;  %p68_p6 = scmp.ne.s32.totalorder %s2462_s26, %s2458_s25 }
  0x74   : > { %s58_s6 = sor.u32 %s57_s16, %s2704_s28  ;;  %p74_p1 = scmp.ne.s32.totalorder %s2458_s25, %s2454_s24 }
  0x75   : > { %p59_p3 = scmp.eq.s32.totalorder %s58_s6, 0  ;;  %p3325_p7 = scmp.eq.s32.totalorder %s2482_s10, 0 }
  0x76   : > { %p3326_p5 = scmp.eq.s32.totalorder %s2631_s11, 0  ;;  %s3285_s15 = sand.u32 1, %s2462_s26  }
  0x77   : > { %p70_p12 = por %p3325_p7, %p68_p6  ;;  %s2792_s7 = sshll.u32 %s3285_s15, 3 }
  0x78   : > { %p2782_p9 = por %p3326_p5, %p74_p1  ;;  %p3329_p11 = scmp.lt.s32.totalorder %s2482_s10, 4 }
  0x79   : > { %s2788_s23 = scalar_select %p59_p3, %s2462_s26, %s61_s9  }
  0x7a   : > { %s3327_s14 = scalar_select %p2782_p9, 1, 0 }
  0x7b   : > { %3328 = sst [smem:[#allocation38_spill]] %s2788_s23  ;;  %p2796_p8 = pnand %p3329_p11, %p70_p12 }
  0x7c   : > { %s3331_s4 = sld [smem:[#allocation41_spill]]  ;;  %s396_s9 = scalar_lea.vmem [#allocation10], %s2792_s7 }
  0x7d   : > { %s406_s6 = sshll.u32 %s396_s9, 4  ;;  %s3290_s13 = scalar_lea.sflag [#allocation11], %s2714_s22  ;;  %s2807_s6 = int_to_ptr.vmem [resolvable:$true] %s406_s6 }
  0x7e   : > { %p2158_p2 = pneg %p2796_p8 }
  0x82   : > { %s1312_s30 = scalar_lea.hbm %s3331_s4, %s2720_s5  ;;  %s2161_s2 = scalar_lea.hbm %s3331_s4, 1024 }
  0x83   : > { %s2804_s16 = scalar_lea.hbm %s1312_s30, 128  ;;  %s2186_s15 = scalar_lea.hbm %s1312_s30, 256 }
  0x84   : > { %p2157_p13 = scmp.ne.s32.totalorder %s2804_s16, %s2186_s15  ;;  %p2162_p3 = scmp.lt.u32.totalorder %s2804_s16, %s3331_s4 }
  0x85   : > { %p2163_p7 = scmp.lt.u32.totalorder %s2161_s2, %s2186_s15  ;;  %p2165_p5 = scmp.lt.u32.totalorder %s2186_s15, %s2804_s16 }
  0x86   : > { %p2159_p6 = pnand %p2158_p2, %p2157_p13 }
  0x87   : > { %p2164_p12 = por %p2163_p7, %p2162_p3 }
  0x88   : > { %p2160_p1 = pneg %p2159_p6 }
  0x89   : > { %p2166_p11 = por %p2165_p5, %p2164_p12 }
  0x8b   : > { %p2167_p10 = pnand %p2166_p11, %p2160_p1 }
  0x8d   : > { %2170 = shalt.err (!%p2167_p10)
}
  0x8e   : > { %s2171_s30 = scalar_lea.vmem %s2807_s6, 128  ;;  %s2489_s9 = smov [#allocation10]  }
  0x8f   : > { %p2172_p13 = scmp.ne.s32.totalorder %s2807_s6, %s2171_s30  ;;  %s2176_s24 = sshll.u32 %s2489_s9, 4  ;;  %s2177_s24 = int_to_ptr.vmem [resolvable:$false] %s2176_s24 }
  0x90   : > { %s2178_s8 = scalar_lea.vmem %s2177_s24, 256  ;;  %p2179_p9 = scmp.lt.s32.totalorder %s2807_s6, %s2177_s24 }
  0x91   : > { %p2174_p6 = pnand %p2172_p13, %p2158_p2  ;;  %p2180_p3 = scmp.lt.s32.totalorder %s2178_s8, %s2171_s30 }
  0x93   : > { %p2175_p0 = pneg %p2174_p6  ;;  %p2181_p7 = por %p2180_p3, %p2179_p9 }
  0x95   : > { %p2182_p12 = pnand %p2181_p7, %p2175_p0 }
  0x97   : > { %2185 = shalt.err (!%p2182_p12)
}
  0x98   : > { %1952 = dma.hbm_to_vmem [thread:$0]  (!%p2796_p8), %s2804_s16, 128, %s2807_s6, %s3290_s13  }
  0x99   : > { %s3332_s1 = sld [smem:[#allocation39_spill]]  ;;  %s334_s30 = scalar_lea.vmem [#allocation4], %s2792_s7 }
  0x9a   : > { %s344_s9 = sshll.u32 %s334_s30, 4  ;;  %s3333_s24 = sand.u32 1, %s2462_s26   ;;  %s345_s9 = int_to_ptr.vmem [resolvable:$true] %s344_s9 }
  0x9b   : > { %s331_s8 = scalar_lea.sflag [#allocation5], %s3333_s24 }
  0x9f   : > { %s1289_s23 = scalar_lea.hbm %s3332_s1, %s2720_s5  ;;  %s2192_s2 = scalar_lea.hbm %s3332_s1, 1024 }
  0xa0   : > { %s2840_s18 = scalar_lea.hbm %s1289_s23, 128  ;;  %s2217_s4 = scalar_lea.hbm %s1289_s23, 256 }
  0xa1   : > { %p2188_p0 = scmp.ne.s32.totalorder %s2840_s18, %s2217_s4  ;;  %p2193_p1 = scmp.lt.u32.totalorder %s2840_s18, %s3332_s1 }
  0xa2   : > { %p2194_p5 = scmp.lt.u32.totalorder %s2192_s2, %s2217_s4  ;;  %p2196_p13 = scmp.lt.u32.totalorder %s2217_s4, %s2840_s18 }
  0xa3   : > { %p2190_p10 = pnand %p2188_p0, %p2158_p2 }
  0xa4   : > { %p2195_p11 = por %p2194_p5, %p2193_p1 }
  0xa5   : > { %p2191_p9 = pneg %p2190_p10 }
  0xa6   : > { %p2197_p6 = por %p2196_p13, %p2195_p11 }
  0xa8   : > { %p2198_p3 = pnand %p2197_p6, %p2191_p9 }
  0xaa   : > { %2201 = shalt.err (!%p2198_p3)
}
  0xab   : > { %s2202_s7 = scalar_lea.vmem %s345_s9, 128  ;;  %s2490_s23 = smov [#allocation4]  }
  0xac   : > { %p2203_p7 = scmp.ne.s32.totalorder %s345_s9, %s2202_s7  ;;  %s2207_s30 = sshll.u32 %s2490_s23, 4  ;;  %s2208_s30 = int_to_ptr.vmem [resolvable:$false] %s2207_s30 }
  0xad   : > { %s2209_s24 = scalar_lea.vmem %s2208_s30, 256  ;;  %p2210_p10 = scmp.lt.s32.totalorder %s345_s9, %s2208_s30 }
  0xae   : > { %p2205_p12 = pnand %p2203_p7, %p2158_p2  ;;  %p2211_p4 = scmp.lt.s32.totalorder %s2209_s24, %s2202_s7 }
  0xb0   : > { %p2206_p0 = pneg %p2205_p12  ;;  %p2212_p1 = por %p2211_p4, %p2210_p10 }
  0xb2   : > { %p2213_p5 = pnand %p2212_p1, %p2206_p0 }
  0xb4   : > { %2216 = shalt.err (!%p2213_p5)
}
  0xb5   : > { %1943 = dma.hbm_to_vmem [thread:$0]  (!%p2796_p8), %s2840_s18, 128, %s345_s9, %s331_s8  }
  0xb6   : > { %s113_s4 = sadd.s32 2, %s2675_s12  ;;  %s3334_s13 = sadd.s32 2, %s2474_s29 }
  0xb7   : > { %s115_s16 = ssub.s32 %s3334_s13, %s113_s4  ;;  %s119_s17 = sadd.s32 1, %s2438_s21 }
  0xb8   : > { %s116_s6 = sor.u32 %s115_s16, %s2704_s28  ;;  %p126_p4 = scmp.ne.s32.totalorder %s2438_s21, %s2434_s20 }
  0xb9   : > { %p117_p2 = scmp.eq.s32.totalorder %s116_s6, 0  ;;  %p132_p9 = scmp.ne.s32.totalorder %s2434_s20, %s2430_s19 }
  0xba   : > { %p3335_p11 = scmp.eq.s32.totalorder %s2482_s10, 0  ;;  %s373_s2 = sand.u32 1, %s2438_s21  }
  0xbb   : > { %s2876_s15 = scalar_select %p117_p2, %s2438_s21, %s119_s17  }
  0xbc   : > { %p128_p13 = por %p126_p4, %p3335_p11  ;;  %p3336_p6 = scmp.eq.s32.totalorder %s2631_s11, 0 }
  0xbd   : > { %s2884_s18 = sshll.u32 %s373_s2, 3  ;;  %s1304_s28 = scalar_lea.hbm %s3256_s3, %s2720_s5 }
  0xbe   : > { %p2880_p3 = por %p132_p9, %p3336_p6  ;;  %s2890_s23 = scalar_lea.hbm %s1304_s28, 256 }
  0xbf   : > { %s375_s19 = scalar_lea.vmem [#allocation9], %s2884_s18  ;;  %p3338_p8 = scmp.lt.s32.totalorder %s2482_s10, 4 }
  0xc0   : > { %s3337_s7 = scalar_select %p2880_p3, 1, 0 }
  0xc1   : > { %s385_s30 = sshll.u32 %s375_s19, 4  ;;  %p2897_p7 = pnand %p3338_p8, %p128_p13  ;;  %s2893_s30 = int_to_ptr.vmem [resolvable:$true] %s385_s30 }
  0xc2   : > { %s3340_s16 = sld [smem:[#allocation42_spill]]  ;;  %s417_s6 = scalar_lea.vmem [#allocation12], %s2723_s27 }
  0xc3   : > { %s426_s2 = sshll.u32 %s417_s6, 4  ;;  %s2248_s9 = scalar_lea.hbm %s1304_s28, 384  ;;  %s2908_s2 = int_to_ptr.vmem [resolvable:$true] %s426_s2 }
  0xc4   : > { %p2219_p12 = scmp.ne.s32.totalorder %s2890_s23, %s2248_s9  ;;  %p3293_p0 = pneg %p2897_p7 }
  0xc5   : > { %s2223_s4 = scalar_lea.hbm %s3256_s3, 1024  ;;  %p2224_p5 = scmp.lt.u32.totalorder %s2890_s23, %s3256_s3 }
  0xc6   : > { %p2221_p10 = pnand %p3293_p0, %p2219_p12  ;;  %p2225_p4 = scmp.lt.u32.totalorder %s2223_s4, %s2248_s9 }
  0xc7   : > { %p2227_p9 = scmp.lt.u32.totalorder %s2248_s9, %s2890_s23 }
  0xc8   : > { %s2905_s17 = scalar_lea.hbm %s3340_s16, %s2720_s5  ;;  %p2222_p1 = pneg %p2221_p10 }
  0xc9   : > { %p2226_p2 = por %p2225_p4, %p2224_p5 }
  0xcb   : > { %p2228_p11 = por %p2227_p9, %p2226_p2 }
  0xcd   : > { %p2229_p13 = pnand %p2228_p11, %p2222_p1 }
  0xcf   : > { %2232 = shalt.err (!%p2229_p13)
}
  0xd0   : > { %s2233_s27 = scalar_lea.vmem %s2893_s30, 128  ;;  %s2491_s28 = smov [#allocation9]  }
  0xd1   : > { %p2234_p6 = scmp.ne.s32.totalorder %s2893_s30, %s2233_s27  ;;  %s2238_s6 = sshll.u32 %s2491_s28, 4  ;;  %s2239_s6 = int_to_ptr.vmem [resolvable:$false] %s2238_s6 }
  0xd2   : > { %s2240_s1 = scalar_lea.vmem %s2239_s6, 256  ;;  %p2241_p10 = scmp.lt.s32.totalorder %s2893_s30, %s2239_s6 }
  0xd3   : > { %p2236_p8 = pnand %p2234_p6, %p3293_p0  ;;  %p2242_p5 = scmp.lt.s32.totalorder %s2240_s1, %s2233_s27 }
  0xd5   : > { %p2237_p12 = pneg %p2236_p8  ;;  %p2243_p4 = por %p2242_p5, %p2241_p10 }
  0xd7   : > { %p2244_p2 = pnand %p2243_p4, %p2237_p12 }
  0xd9   : > { %2247 = shalt.err (!%p2244_p2)
}
  0xda   : > { %s3341_s9 = scalar_lea.sflag [#allocation8], %s2714_s22  ;;  %s2249_s8 = scalar_lea.hbm %s2905_s17, 128 }
  0xdb   : > { %1949 = dma.hbm_to_vmem [thread:$0]  (!%p2897_p7), %s2890_s23, 128, %s2893_s30, %s3341_s9  }
  0xdc   : > { %p2250_p1 = scmp.ne.s32.totalorder %s2905_s17, %s2249_s8  ;;  %p3342_p9 = scmp.ne.s32.totalorder %s3324_s0, 0 }
  0xdd   : > { %s2254_s13 = scalar_lea.hbm %s3340_s16, 1024  ;;  %p2255_p8 = scmp.lt.u32.totalorder %s2905_s17, %s3340_s16 }
  0xde   : > { %p3343_p11 = pneg %p3342_p9  ;;  %p2256_p12 = scmp.lt.u32.totalorder %s2254_s13, %s2249_s8 }
  0xdf   : > { %p2258_p5 = scmp.lt.u32.totalorder %s2249_s8, %s2905_s17 }
  0xe0   : > { %p2252_p13 = pnand %p2250_p1, %p3343_p11  ;;  %p2257_p10 = por %p2256_p12, %p2255_p8 }
  0xe2   : > { %p2253_p6 = pneg %p2252_p13  ;;  %p2259_p4 = por %p2258_p5, %p2257_p10 }
  0xe4   : > { %p2260_p2 = pnand %p2259_p4, %p2253_p6 }
  0xe6   : > { %2263 = shalt.err (!%p2260_p2)
}
  0xe7   : > { %s2264_s23 = scalar_lea.vmem %s2908_s2, 128  ;;  %s2492_s30 = smov [#allocation12]  }
  0xe8   : > { %p2265_p1 = scmp.ne.s32.totalorder %s2908_s2, %s2264_s23  ;;  %s2269_s6 = sshll.u32 %s2492_s30, 4  ;;  %s2270_s6 = int_to_ptr.vmem [resolvable:$false] %s2269_s6 }
  0xe9   : > { %s2271_s1 = scalar_lea.vmem %s2270_s6, 256  ;;  %p2272_p3 = scmp.lt.s32.totalorder %s2908_s2, %s2270_s6 }
  0xea   : > { %p2267_p13 = pnand %p2265_p1, %p3343_p11  ;;  %p2273_p8 = scmp.lt.s32.totalorder %s2271_s1, %s2264_s23 }
  0xec   : > { %p2268_p0 = pneg %p2267_p13  ;;  %p2274_p12 = por %p2273_p8, %p2272_p3 }
  0xee   : > { %p2275_p10 = pnand %p2274_p12, %p2268_p0 }
  0xf0   : > { %2278 = shalt.err (!%p2275_p10)
}
  0xf1   : > { %s3344_s9 = scalar_lea.sflag [#allocation11], %s2714_s22  ;;  %s3345_s4 = sld [smem:[#allocation43_spill]] }
  0xf2   : > { %1955 = dma.hbm_to_vmem [thread:$0]  (!%p3342_p9), %s2905_s17, 128, %s2908_s2, %s3344_s9  }
  0xf3   : > { %s437_s27 = scalar_lea.vmem [#allocation13], %s2884_s18  ;;  %s434_s0 = scalar_lea.sflag [#allocation14], %s2714_s22 }
  0xf4   : > { %s447_s28 = sshll.u32 %s437_s27, 4  ;;  %p3346_p0 = pneg %p2897_p7  ;;  %s448_s28 = int_to_ptr.vmem [resolvable:$true] %s447_s28 }
  0xf7   : > { %s1327_s13 = scalar_lea.hbm %s3345_s4, %s2720_s5  ;;  %s2284_s6 = scalar_lea.hbm %s3345_s4, 1024 }
  0xf8   : > { %s2966_s23 = scalar_lea.hbm %s1327_s13, 256  ;;  %s2309_s30 = scalar_lea.hbm %s1327_s13, 384 }
  0xf9   : > { %p2280_p3 = scmp.ne.s32.totalorder %s2966_s23, %s2309_s30  ;;  %p2285_p9 = scmp.lt.u32.totalorder %s2966_s23, %s3345_s4 }
  0xfa   : > { %p2286_p4 = scmp.lt.u32.totalorder %s2284_s6, %s2309_s30  ;;  %p2288_p1 = scmp.lt.u32.totalorder %s2309_s30, %s2966_s23 }
  0xfb   : > { %p2282_p6 = pnand %p2280_p3, %p3346_p0 }
  0xfc   : > { %p2287_p2 = por %p2286_p4, %p2285_p9 }
  0xfd   : > { %p2283_p5 = pneg %p2282_p6 }
  0xfe   : > { %p2289_p11 = por %p2288_p1, %p2287_p2 }
 0x100   : > { %p2290_p13 = pnand %p2289_p11, %p2283_p5 }
 0x102   : > { %2293 = shalt.err (!%p2290_p13)
}
 0x103   : > { %s2294_s22 = scalar_lea.vmem %s448_s28, 128  ;;  %p3347_p12 = pmov %p3346_p0 }
 0x104   : > { %p2295_p8 = scmp.ne.s32.totalorder %s448_s28, %s2294_s22  ;;  %s2493_s1 = smov [#allocation13]  }
 0x105   : > { %s2299_s9 = sshll.u32 %s2493_s1, 4  ;;  %s2300_s9 = int_to_ptr.vmem [resolvable:$false] %s2299_s9 }
 0x106   : > { %p2297_p10 = pnand %p2295_p8, %p3347_p12  ;;  %s2301_s8 = scalar_lea.vmem %s2300_s9, 256 }
 0x107   : > { %p2302_p0 = scmp.lt.s32.totalorder %s448_s28, %s2300_s9  ;;  %p2303_p6 = scmp.lt.s32.totalorder %s2301_s8, %s2294_s22 }
 0x108   : > { %p2298_p3 = pneg %p2297_p10 }
 0x109   : > { %p2304_p4 = por %p2303_p6, %p2302_p0 }
 0x10b   : > { %p2305_p9 = pnand %p2304_p4, %p2298_p3 }
 0x10d   : > { %2308 = shalt.err (!%p2305_p9)
}
 0x10e   : > { %1958 = dma.hbm_to_vmem [thread:$0]  (!%p2897_p7), %s2966_s23, 128, %s448_s28, %s434_s0  }
 0x10f   : > { %s3348_s19 = sld [smem:[#allocation32_spill]] }
 0x115   : > { %p3349_p5 = scmp.ne.s32.totalorder %s3348_s19, 0 }
 0x116   : > { %s458_s13 = sand.u32 (!%p3349_p5), 1, %s2458_s25   ;;  %p3350_p2 = scmp.ne.s32.totalorder (!%p3349_p5), %s3327_s14, 0 }
 0x117   : > { %456 = sbr.rel (%p3349_p5) target bundleno = 1053 (0x41d), region = 52  ;;  %s2990_s27 = sshll.u32 (!%p3349_p5), %s458_s13, 3 }
 0x118   : > { %s459_s30 = scalar_lea.sflag (!%p3349_p5), [#allocation5], %s458_s13  ;;  %s462_s17 = scalar_lea.vmem (!%p3349_p5), [#allocation4], %s2990_s27 }
 0x11e   : > { %2397 = dma.done.wait (%p3350_p2), %s459_s30, 128  }
 0x11f   : > { %2399 = vsyncadd (%p3350_p2), %s459_s30, 4294967168  ;;  %s3351_s24 = sld [smem:[#allocation27_spill]]  ;;  %s3352_s28 = sld [smem:[#allocation34_spill]] }
 0x120   : > { %s467_s23 = sand.u32 1, %s2631_s11  }
 0x121   : > { %s468_s6 = scalar_lea.sflag [#allocation8], %s467_s23 }
 0x125   : > { %s469_s0 = sand.u32 1, %s3351_s24   ;;  %p3353_p7 = scmp.ne.s32.totalorder %s3352_s28, 0 }
 0x126   : > { %s3001_s2 = sshll.u32 %s469_s0, 3 }
 0x127   : > { %s471_s5 = scalar_lea.vmem [#allocation7], %s3001_s2 }
 0x128   : > { %2401 = dma.done.wait (%p3353_p7), %s468_s6, 128  }
 0x129   : > { %2403 = vsyncadd (%p3353_p7), %s468_s6, 4294967168  ;;  %s478_s18 = sand.u32 1, %s2434_s20   ;;  %p3354_p1 = scmp.ne.s32.totalorder %s3337_s7, 0 }
 0x12a   : > { %s3009_s22 = sshll.u32 %s478_s18, 3 }
 0x12b   : > { %s480_s1 = scalar_lea.vmem [#allocation9], %s3009_s22 }
 0x12c   : > { %2405 = dma.done.wait (%p3354_p1), %s468_s6, 128  }
 0x12d   : > { %2407 = vsyncadd (%p3354_p1), %s468_s6, 4294967168  ;;  %s486_s9 = scalar_lea.sflag [#allocation11], %s467_s23  ;;  %s489_s8 = scalar_lea.vmem [#allocation10], %s2990_s27 }
 0x12e   : > { %2409 = dma.done.wait (%p3350_p2), %s486_s9, 128  }
 0x12f   : > { %2411 = vsyncadd (%p3350_p2), %s486_s9, 4294967168  ;;  %s498_s19 = scalar_lea.vmem [#allocation12], %s3001_s2 }
 0x130   : > { %2413 = dma.done.wait (%p3353_p7), %s486_s9, 128  }
 0x131   : > { %2415 = vsyncadd (%p3353_p7), %s486_s9, 4294967168  ;;  %s504_s13 = scalar_lea.sflag [#allocation14], %s467_s23  ;;  %s507_s30 = scalar_lea.vmem [#allocation13], %s3009_s22 }
 0x132   : > { %2417 = dma.done.wait (%p3354_p1), %s504_s13, 128  }
 0x133   : > { %2419 = vsyncadd (%p3354_p1), %s504_s13, 4294967168  ;;  %p3355_p11 = scmp.eq.s32.totalorder %s2631_s11, 0 }
 0x135   : > { %2421 = dma.done.wait (%p3355_p11), [#allocation14], 2048   ;;  %p3356_p13 = pmov %p3355_p11 }
 0x136   : > { %s3357_s14 = sld [smem:[#allocation29_spill]]  ;;  %s3358_s6 = sld [smem:[#allocation30_spill]]  ;;  %v582_v0 = vlaneseq  ;;  %v2494_v1 = vmov 0.0   ;;  %v2495_v2 = vmov 0.0|0.0   ;;  %vm2496_vm0 = vmmov 0   ;;  %v576_v10 = vld [vmem:[%s498_s19] sm:$0xff] }
 0x137   : > { %2423 = vsyncadd (%p3356_p13), [#allocation14], 4294965248  ;;  %684 = vmatprep.mubr.f32.mxu0 %v2494_v1  ;;  %1796 = vmatprep.subr.bf16.mxu1 %v2495_v2  ;;  %v577_v11 = vld [vmem:[%s489_s8] sm:$0xff]  ;;  %v574_v14 = vld [vmem:[%s462_s17] sm:$0xff]  ;;  %s3359_s27 = sld [smem:[#allocation44_spill]]  ;;  %vm616_vm4 = vcmask 195584  }
 0x138   : > { %v583_v3 = vshrl.u32 %v582_v0, 7  ;;  %1642 = vmatprep.mubr.msk.f32.mxu1 %vm2496_vm0, %v2494_v1  ;;  %v573_v13 = vld [vmem:[%s471_s5] sm:$0xff]  ;;  %v832_v19 = vld [vmem:[#allocation15] sm:$0xff]  ;;  %v833_v20 = vld [vmem:[#allocation15 + $0x8] sm:$0xff]  ;;  %s3360_s17 = sld [smem:[#allocation35_spill]]  ;;  %s568_s22 = scalar_lea.vmem [#allocation16], %s3001_s2 }
 0x139   : > { %v578_v15 = vld [vmem:[%s507_s30] sm:$0xff]  ;;  %v3051_v28 = vpack.c.bf16 %v833_v20, %v832_v19  ;;  %v575_v31 = vld [vmem:[%s480_s1] sm:$0xff]  ;;  %s1250_s1 = sshll.u32 %s568_s22, 4  ;;  %s2497_s2 = smov [#allocation16]   ;;  %s3171_s1 = int_to_ptr.vmem [resolvable:$true] %s1250_s1 }
 0x13a   : > { %v584_v5 = vadd.s32 8, %v583_v3  ;;  %v585_v7 = vadd.s32 16, %v583_v3  ;;  %v834_v25 = vld [vmem:[#allocation15 + $0x10] sm:$0xff]  ;;  %v835_v26 = vld [vmem:[#allocation15 + $0x18] sm:$0xff]  ;;  %v836_v38 = vld [vmem:[#allocation15 + $0x20] sm:$0xff] }
 0x13b   : > { %1798 = vmatpush3.bf16.msra.mxu1 %v3051_v28  ;;  %v3056_v36 = vpack.c.bf16 %v835_v26, %v834_v25  ;;  %v837_v39 = vld [vmem:[#allocation15 + $0x28] sm:$0xff]  ;;  %v838_v48 = vld [vmem:[#allocation15 + $0x30] sm:$0xff]  ;;  %v839_v49 = vld [vmem:[#allocation15 + $0x38] sm:$0xff] }
 0x13c   : > { %s1499_s18 = sshll.u32 %s3357_s14, 3  ;;  %s579_s28 = sld [smem:[#allocation3 + %s3358_s6]]  ;;  %1799 = vmatprep.subr.bf16.mxu1 %v2495_v2  ;;  %v3064_v44 = vpack.c.bf16 %v837_v39, %v836_v38  ;;  %v3070_v51 = vpack.c.bf16 %v839_v49, %v838_v48  ;;  %v840_v52 = vld [vmem:[#allocation15 + $0x40] sm:$0xff]  ;;  %v841_v53 = vld [vmem:[#allocation15 + $0x48] sm:$0xff]  ;;  %v842_v56 = vld [vmem:[#allocation15 + $0x50] sm:$0xff] }
 0x13d   : > { %s1500_s9 = sadd.s32 4294967288, %s1499_s18  ;;  %v615_v41 = vld [vmem:[%s3359_s27] sm:$0xff]  ;;  %v3079_v55 = vpack.c.bf16 %v841_v53, %v840_v52  ;;  %v844_v59 = vld [vmem:[#allocation15 + $0x60] sm:$0xff]  ;;  %v845_v60 = vld [vmem:[#allocation15 + $0x68] sm:$0xff]  ;;  %s1508_s23 = sshll.u32 %s3358_s6, 1 }
 0x13e   : > { %v586_v4 = vstv %s1500_s9  ;;  %v843_v57 = vld [vmem:[#allocation15 + $0x58] sm:$0xff]  ;;  %v3093_v61 = vpack.c.bf16 %v845_v60, %v844_v59  ;;  %v846_v62 = vld [vmem:[#allocation15 + $0x70] sm:$0xff]  ;;  %s1246_s5 = sadd.s32 %s3357_s14, %s1508_s23  ;;  %s3361_s18 = sld [smem:[#allocation46_spill]] }
 0x13f   : > { %v587_v6 = vadd.s32 %v586_v4, %v583_v3  ;;  %v588_v8 = vadd.s32 %v586_v4, %v584_v5  ;;  %v589_v9 = vadd.s32 %v586_v4, %v585_v7  ;;  %1801 = vmatpush3.bf16.msra.mxu1 %v3056_v36  ;;  %v3085_v58 = vpack.c.bf16 %v843_v57, %v842_v56  ;;  %v847_v63 = vld [vmem:[#allocation15 + $0x78] sm:$0xff]  ;;  %s1509_s8 = sshll.u32 %s1246_s5, 7  ;;  %s1235_s9 = scalar_lea.sflag [#allocation6], %s469_s0 }
 0x140   : > { %1802 = vmatprep.subr.bf16.mxu1 %v2495_v2  ;;  %v3099_v3 = vpack.c.bf16 %v847_v63, %v846_v62  ;;  %s2310_s6 = scalar_lea.vmem %s3171_s1, 128  ;;  %p3362_p12 = scmp.ne.s32.totalorder %s3360_s17, 0 }
 0x141   : > { %p2311_p8 = scmp.ne.s32.totalorder %s3171_s1, %s2310_s6  ;;  %s2314_s14 = sshll.u32 %s2497_s2, 4  ;;  %s2315_s14 = int_to_ptr.vmem [resolvable:$false] %s2314_s14 }
 0x142   : > { %v590_v12 = vstv %s579_s28  ;;  %s2316_s11 = scalar_lea.vmem %s2315_s14, 256  ;;  %p2317_p0 = scmp.lt.s32.totalorder %s3171_s1, %s2315_s14 }
 0x143   : > { %vm591_vm1 = vcmp.lt.s32.totalorder %v587_v6, %v590_v12  ;;  %vm592_vm2 = vcmp.lt.s32.totalorder %v588_v8, %v590_v12  ;;  %vm593_vm3 = vcmp.lt.s32.totalorder %v589_v9, %v590_v12  ;;  %1804 = vmatpush3.bf16.msra.mxu1 %v3064_v44  ;;  %p2312_p10 = pnand %p2311_p8, %p3362_p12  ;;  %p2318_p6 = scmp.lt.s32.totalorder %s2316_s11, %s2310_s6 }
 0x144   : > { %v1501_v16 = vsel %vm591_vm1, 1.0, %v2494_v1  ;;  %v1502_v17 = vsel %vm592_vm2, 1.0, %v2494_v1  ;;  %v1503_v18 = vsel %vm593_vm3, 1.0, %v2494_v1  ;;  %1805 = vmatprep.subr.bf16.mxu1 %v2495_v2  ;;  %s3176_s28 = scalar_lea.hbm %s3361_s18, %s1509_s8 }
 0x145   : > { %v603_v21 = vmul.f32 %v1501_v16, %v576_v10  ;;  %v604_v22 = vmul.f32 %v1502_v17, %v577_v11  ;;  %v600_v23 = vmul.f32 %v1501_v16, %v573_v13  ;;  %v601_v24 = vmul.f32 %v1502_v17, %v574_v14  ;;  %p2313_p3 = pneg %p2312_p10  ;;  %p2319_p4 = por %p2318_p6, %p2317_p0 }
 0x146   : > { %v605_v27 = vmul.f32 %v1503_v18, %v578_v15  ;;  %v602_v37 = vmul.f32 %v1503_v18, %v575_v31 }
 0x147   : > { %v1785_v29 = vpack.c.bf16 %v604_v22, %v603_v21  ;;  %v1787_v30 = vpack.c.bf16 %v601_v24, %v600_v23  ;;  %v609_v32 = vmul.f32 %v603_v21, %v603_v21  ;;  %v610_v33 = vmul.f32 %v604_v22, %v604_v22  ;;  %1807 = vmatpush3.bf16.msra.mxu1 %v3070_v51  ;;  %p2320_p9 = pnand %p2319_p4, %p2313_p3 }
 0x148   : > { %v606_v34 = vmul.f32 %v600_v23, %v600_v23  ;;  %v607_v35 = vmul.f32 %v601_v24, %v601_v24  ;;  %v611_v43 = vmul.f32 %v605_v27, %v605_v27  ;;  %v612_v45 = vmul.f32 %v603_v21, %v600_v23  ;;  %1808 = vmatprep.subr.bf16.mxu1 %v2495_v2 }
 0x149   : > { %1786 = vmatprep.subr.bf16.mxu0 %v1785_v29  ;;  %v1789_v40 = vpack.c.bf16 %v610_v33, %v609_v32  ;;  %v613_v46 = vmul.f32 %v604_v22, %v601_v24  ;;  %v608_v47 = vmul.f32 %v602_v37, %v602_v37  ;;  %v614_v54 = vmul.f32 %v605_v27, %v602_v37 }
 0x14a   : > { %1788 = vmatpush1.bf16.msra.mxu0 %v1787_v30  ;;  %v1791_v42 = vpack.c.bf16 %v607_v35, %v606_v34  ;;  %v1220_v34 = vand.u32 127, %v582_v0 }
 0x14b   : > { %624 = vmatprep.subr.mxu0 %v605_v27  ;;  %v1794_v50 = vpack.c.bf16 %v613_v46, %v612_v45  ;;  %1810 = vmatpush3.bf16.msra.mxu1 %v3079_v55 }
 0x14c   : > { %1811 = vmatprep.subr.bf16.mxu1 %v2495_v2  ;;  %vm1221_vm5 = vcmp.lt.s32.totalorder %v1220_v34, 16 }
 0x14e   : > { %625 = vmatpush1.msra.mxu0 %v602_v37 }
 0x14f   : > { %1504 = vmatmul.mubr.msk.f32.vlgmr.msra.gmra.mrb[0].mxu0 %vm616_vm4, %v615_v41  ;;  %1790 = vmatprep.subr.bf16.mxu0 %v1789_v40 }
 0x150   : > { %1792 = vmatpush1.bf16.msra.mxu0 %v1791_v42  ;;  %755 = vmatprep.mubr.f32.mxu0 %v2494_v1 }
 0x151   : > { %695 = vmatprep.subr.mxu0 %v611_v43  ;;  %1813 = vmatpush3.bf16.msra.mxu1 %v3085_v58 }
 0x152   : > { %1814 = vmatprep.subr.bf16.mxu1 %v2495_v2 }
 0x154   : > { %696 = vmatpush1.msra.mxu0 %v608_v47 }
 0x155   : > { %1505 = vmatmul.mubr.msk.f32.vlgmr.msra.gmra.mrb[2].mxu0 %vm616_vm4, %v615_v41  ;;  %1793 = vmatprep.subr.bf16.mxu0 %v2495_v2 }
 0x156   : > { %1795 = vmatpush3.bf16.msra.mxu0 %v1794_v50  ;;  %1607 = vmatprep.mubr.msk.f32.mxu0 %vm2496_vm0, %v2494_v1 }
 0x157   : > { %1605 = vmatprep.subr.mxu0 %v2494_v1  ;;  %1816 = vmatpush3.bf16.msra.mxu1 %v3093_v61 }
 0x158   : > { %1817 = vmatprep.subr.bf16.mxu1 %v2495_v2 }
 0x15a   : > { %1606 = vmatpush3.msra.mxu0 %v614_v54 }
 0x15b   : > { %1608 = vmatmul.mubr.msk.f32.vlgmr.msra.gmra.mrb[4].mxu0 %vm616_vm4, %v615_v41  ;;  %1820 = vmatprep.subr.bf16.mxu0 %v2495_v2 }
 0x15c   : > { %1822 = vmatpush3.bf16.msra.mxu0 %v3051_v28  ;;  %1677 = vmatprep.mubr.msk.f32.mxu0 %vm2496_vm0, %v2494_v1 }
 0x15d   : > { %1823 = vmatprep.subr.bf16.mxu0 %v2495_v2  ;;  %1819 = vmatpush3.bf16.msra.mxu1 %v3099_v3 }
 0x15e   : > { %1844 = vmatprep.subr.bf16.mxu1 %v2495_v2 }
 0x160   : > { %1825 = vmatpush3.bf16.msra.mxu0 %v3056_v36 }
 0x161   : > { %1826 = vmatprep.subr.bf16.mxu0 %v2495_v2 }
 0x164   : > { %1828 = vmatpush3.bf16.msra.mxu0 %v3064_v44 }
 0x165   : > { %1829 = vmatprep.subr.bf16.mxu0 %v2495_v2 }
 0x168   : > { %1831 = vmatpush3.bf16.msra.mxu0 %v3070_v51 }
 0x169   : > { %1832 = vmatprep.subr.bf16.mxu0 %v2495_v2 }
 0x16c   : > { %1834 = vmatpush3.bf16.msra.mxu0 %v3079_v55 }
 0x16d   : > { %1835 = vmatprep.subr.bf16.mxu0 %v2495_v2 }
 0x170   : > { %1837 = vmatpush3.bf16.msra.mxu0 %v3085_v58 }
 0x171   : > { %1838 = vmatprep.subr.bf16.mxu0 %v2495_v2 }
 0x174   : > { %1840 = vmatpush3.bf16.msra.mxu0 %v3093_v61 }
 0x175   : > { %1841 = vmatprep.subr.bf16.mxu0 %v2495_v2 }
 0x178   : > { %1843 = vmatpush3.bf16.msra.mxu0 %v3099_v3 }
 0x179   : > { %1868 = vmatprep.subr.bf16.mxu0 %v2495_v2 }
 0x222   : > { %v686_v4 = vpop.f32.mrb[0].mxu0 }
 0x223   : > { %v688_v5 = vpop.f32.mrb[1].mxu0  ;;  %1643 = vmatmul.mubr.f32.vlgmr.msra.gmra.mrb[0].mxu1 %v686_v4 }
 0x224   : > { %1846 = vmatpush3.bf16.msra.mxu1 %v3051_v28  ;;  %1678 = vmatmul.mubr.f32.vlgmr.msra.gmra.mrb[6].mxu0 %v688_v5 }
 0x225   : > { %1870 = vmatpush3.bf16.msra.mxu0 %v3051_v28  ;;  %1847 = vmatprep.subr.bf16.mxu1 %v2495_v2 }
 0x226   : > { %1871 = vmatprep.subr.bf16.mxu0 %v2495_v2  ;;  %1712 = vmatprep.mubr.msk.f32.mxu1 %vm2496_vm0, %v2494_v1 }
 0x227   : > { %1747 = vmatprep.mubr.msk.f32.mxu0 %vm2496_vm0, %v2494_v1 }
 0x228   : > { %1849 = vmatpush3.bf16.msra.mxu1 %v3056_v36  ;;  %v757_v6 = vpop.f32.mrb[2].mxu0 }
 0x229   : > { %1873 = vmatpush3.bf16.msra.mxu0 %v3056_v36  ;;  %1850 = vmatprep.subr.bf16.mxu1 %v2495_v2  ;;  %v759_v7 = vpop.f32.mrb[3].mxu0 }
 0x22a   : > { %1874 = vmatprep.subr.bf16.mxu0 %v2495_v2 }
 0x22c   : > { %1852 = vmatpush3.bf16.msra.mxu1 %v3064_v44 }
 0x22d   : > { %1876 = vmatpush3.bf16.msra.mxu0 %v3064_v44  ;;  %1853 = vmatprep.subr.bf16.mxu1 %v2495_v2 }
 0x22e   : > { %1877 = vmatprep.subr.bf16.mxu0 %v2495_v2  ;;  %v828_v8 = vpop.f32.mrb[4].mxu0 }
 0x22f   : > { %v1609_v9 = vpop.f32.mrb[5].mxu0 }
 0x230   : > { %1855 = vmatpush3.bf16.msra.mxu1 %v3070_v51 }
 0x231   : > { %1879 = vmatpush3.bf16.msra.mxu0 %v3070_v51  ;;  %1856 = vmatprep.subr.bf16.mxu1 %v2495_v2 }
 0x232   : > { %1880 = vmatprep.subr.bf16.mxu0 %v2495_v2 }
 0x234   : > { %1858 = vmatpush3.bf16.msra.mxu1 %v3079_v55 }
 0x235   : > { %1882 = vmatpush3.bf16.msra.mxu0 %v3079_v55  ;;  %1859 = vmatprep.subr.bf16.mxu1 %v2495_v2 }
 0x236   : > { %1883 = vmatprep.subr.bf16.mxu0 %v2495_v2 }
 0x238   : > { %1861 = vmatpush3.bf16.msra.mxu1 %v3085_v58 }
 0x239   : > { %1885 = vmatpush3.bf16.msra.mxu0 %v3085_v58  ;;  %1862 = vmatprep.subr.bf16.mxu1 %v2495_v2 }
 0x23a   : > { %1886 = vmatprep.subr.bf16.mxu0 %v2495_v2 }
 0x23c   : > { %1864 = vmatpush3.bf16.msra.mxu1 %v3093_v61 }
 0x23d   : > { %1888 = vmatpush3.bf16.msra.mxu0 %v3093_v61  ;;  %1865 = vmatprep.subr.bf16.mxu1 %v2495_v2 }
 0x23e   : > { %1889 = vmatprep.subr.bf16.mxu0 %v2495_v2 }
 0x240   : > { %1867 = vmatpush3.bf16.msra.mxu1 %v3099_v3 }
 0x241   : > { %1891 = vmatpush3.bf16.msra.mxu0 %v3099_v3  ;;  %1892 = vmatprep.subr.bf16.mxu1 %v2495_v2 }
 0x243   : > { %1713 = vmatmul.mubr.f32.vlgmr.msra.gmra.mrb[2].mxu1 %v757_v6 }
 0x244   : > { %1748 = vmatmul.mubr.f32.vlgmr.msra.gmra.mrb[8].mxu0 %v759_v7  ;;  %1894 = vmatpush3.bf16.msra.mxu1 %v3051_v28 }
 0x245   : > { %1895 = vmatprep.subr.bf16.mxu1 %v2495_v2  ;;  %1782 = vmatprep.mubr.msk.f32.mxu1 %vm2496_vm0, %v2494_v1 }
 0x248   : > { %1897 = vmatpush3.bf16.msra.mxu1 %v3056_v36 }
 0x249   : > { %1898 = vmatprep.subr.bf16.mxu1 %v2495_v2 }
 0x24c   : > { %1900 = vmatpush3.bf16.msra.mxu1 %v3064_v44 }
 0x24d   : > { %1901 = vmatprep.subr.bf16.mxu1 %v2495_v2 }
 0x250   : > { %1903 = vmatpush3.bf16.msra.mxu1 %v3070_v51 }
 0x251   : > { %1904 = vmatprep.subr.bf16.mxu1 %v2495_v2 }
 0x254   : > { %1906 = vmatpush3.bf16.msra.mxu1 %v3079_v55 }
 0x255   : > { %1907 = vmatprep.subr.bf16.mxu1 %v2495_v2 }
 0x258   : > { %1909 = vmatpush3.bf16.msra.mxu1 %v3085_v58 }
 0x259   : > { %1910 = vmatprep.subr.bf16.mxu1 %v2495_v2 }
 0x25c   : > { %1912 = vmatpush3.bf16.msra.mxu1 %v3093_v61 }
 0x25d   : > { %1913 = vmatprep.subr.bf16.mxu1 %v2495_v2 }
 0x260   : > { %1915 = vmatpush3.bf16.msra.mxu1 %v3099_v3 }
 0x263   : > { %1783 = vmatmul.mubr.f32.vlgmr.msra.gmra.mrb[4].mxu1 %v828_v8 }
 0x2f6   : > { %v914_v1 = vpop.f32.mrb[0].mxu1 }
 0x2f7   : > { %v1198_v10 = vmul.f32 %v914_v1, %v914_v1  ;;  %v1644_v11 = vpop.f32.mrb[1].mxu1  ;;  %v984_v12 = vpop.f32.mrb[6].mxu0 }
 0x2f8   : > { %v1199_v13 = vmul.f32 %v984_v12, %v984_v12  ;;  %v1200_v14 = vmul.f32 %v984_v12, %v914_v1  ;;  %v1679_v15 = vpop.f32.mrb[7].mxu0 }
 0x2fa   : > { %v1209_v16 = vadd.f32 %v1199_v13, %v1198_v10  ;;  %v1204_v29 = vmul.f32 2.0, %v1200_v14 }
 0x2fc   : > { %v1210_v24 = vadd.f32 0.0001, %v1209_v16  ;;  %v1205_v35 = vadd.f32 0.0001, %v1204_v29 }
 0x316   : > { %v1054_v17 = vpop.f32.mrb[2].mxu1 }
 0x317   : > { %v1201_v18 = vsub.f32 %v1054_v17, %v1198_v10  ;;  %v1714_v19 = vpop.f32.mrb[3].mxu1  ;;  %v1124_v20 = vpop.f32.mrb[8].mxu0 }
 0x318   : > { %v1202_v21 = vsub.f32 %v1124_v20, %v1199_v13  ;;  %v1749_v22 = vpop.f32.mrb[9].mxu0 }
 0x31a   : > { %v1211_v23 = vadd.f32 %v1202_v21, %v1201_v18 }
 0x31c   : > { %v1212_v2 = vadd.f32 0.0009, %v1211_v23 }
 0x31e   : > { %v1213_v25 = vmul.f32 %v1212_v2, %v1210_v24 }
 0x320   : > { %2086 = vrcp.f32 %v1213_v25 }
 0x32a   : > { %v2087_v26 = vpop.eup %2086 }
 0x32b   : > { %v1215_v27 = vmul.f32 %v2087_v26, %v1213_v25 }
 0x32d   : > { %v1216_v33 = vsub.f32 2.0, %v1215_v27 }
 0x32f   : > { %v1217_v38 = vmul.f32 %v2087_v26, %v1216_v33 }
 0x336   : > { %v1194_v28 = vpop.f32.mrb[4].mxu1 }
 0x337   : > { %v1203_v30 = vsub.f32 %v1194_v28, %v1200_v14  ;;  %v1784_v31 = vpop.f32.mrb[5].mxu1 }
 0x339   : > { %v1206_v32 = vmul.f32 2.0, %v1203_v30 }
 0x33b   : > { %v1207_v36 = vadd.f32 0.0009, %v1206_v32 }
 0x33d   : > { %v1208_v37 = vmul.f32 %v1207_v36, %v1205_v35 }
 0x33f   : > { %v1218_v39 = vmul.f32 %v1217_v38, %v1208_v37 }
 0x341   : > { %v1222_v40 = vsel %vm1221_vm5, %v1218_v39, 0.0 }
 0x342   : > { %1223 = vadd.xlane.f32.xlu0 %v1222_v40 }
 0x3cf   : > { %v1224_v41 = vpop.xlane.xlu0 %1223 }
 0x3d0   : > { %v1225_v42 = vrot.slane %v1224_v41, 4 }
 0x3d2   : > { %v1226_v43 = vadd.f32 %v1225_v42, %v1224_v41 }
 0x3d4   : > { %v1227_v44 = vrot.slane %v1226_v43, 2 }
 0x3d6   : > { %v1228_v45 = vadd.f32 %v1227_v44, %v1226_v43 }
 0x3d8   : > { %v1229_v46 = vrot.slane %v1228_v45, 1 }
 0x3da   : > { %v1230_v0 = vadd.f32 %v1229_v46, %v1228_v45 }
 0x3dc   : > { %1916 = vpush %v1230_v0 }
 0x40d   : > { %s1917_s19 = spop %1916 }
 0x40e   : > { %v1232_v47 = vstv %s1917_s19 }
 0x40f   : > { %1233 = vst [vmem:[%s568_s22] sm:$0xff] %v1232_v47 }
 0x410   : > { %2323 = shalt.err (!%p2320_p9)
}
 0x411   : > { %s2324_s24 = scalar_lea.hbm %s3176_s28, 128  ;;  %s2328_s27 = scalar_lea.hbm %s3361_s18, 512 }
 0x412   : > { %p2325_p5 = scmp.ne.s32.totalorder %s3176_s28, %s2324_s24  ;;  %p2329_p1 = scmp.lt.u32.totalorder %s3176_s28, %s3361_s18 }
 0x413   : > { %p2330_p11 = scmp.lt.u32.totalorder %s2328_s27, %s2324_s24  ;;  %p2332_p8 = scmp.lt.u32.totalorder %s2324_s24, %s3176_s28 }
 0x414   : > { %p2326_p2 = pnand %p2325_p5, %p3362_p12 }
 0x415   : > { %p2331_p13 = por %p2330_p11, %p2329_p1 }
 0x416   : > { %p2327_p7 = pneg %p2326_p2 }
 0x417   : > { %p2333_p10 = por %p2332_p8, %p2331_p13 }
 0x419   : > { %p2334_p3 = pnand %p2333_p10, %p2327_p7 }
 0x41b   : > { %2337 = shalt.err (!%p2334_p3)
}
 0x41c   : > { %1934 = dma.vmem_to_hbm [thread:$0]  (%p3362_p12), %s3171_s1, 128, %s3176_s28, %s1235_s9  }
 0x41d PF: > { %s3363_s22 = sld [smem:[#allocation26_spill]]  ;;  %s3364_s8 = sld [smem:[#allocation36_spill]] }
 0x41e   : > { %p1966_p0 = scmp.ge.s32.totalorder %s2482_s10, 2 }
 0x423   : > { %s1262_s19 = sand.u32 1, %s3363_s22   ;;  %p3365_p6 = scmp.ne.s32.totalorder %s3364_s8, 0 }
 0x424   : > { %s1263_s13 = scalar_lea.sflag [#allocation6], %s1262_s19 }
 0x425   : > { %p1960_p4 = pnand %p1966_p0, %p3365_p6 }
 0x427   : > { %2425 = dma.done.wait (!%p1960_p4), %s1263_s13, 128  }
 0x428   : > { %2427 = vsyncadd (!%p1960_p4), %s1263_s13, 4294967168  ;;  %s38_s10 = sadd.s32 1, %s2482_s10   ;;  %s3367_s0 = sld [smem:[#allocation27_spill]] }
 0x429   : > { %p3206_p9 = scmp.ge.s32.totalorder %s38_s10, 6   ;;  %s3368_s22 = sld [smem:[#allocation28_spill]] }
 0x42a   : > { %s3369_s23 = sld [smem:[#allocation37_spill]]  ;;  %s3370_s17 = sld [smem:[#allocation38_spill]] }
 0x42b   : > { %s3371_s28 = sld [smem:[#allocation31_spill]]  ;;  %s3372_s1 = sld [smem:[#allocation33_spill]] }
 0x42c   : > { %s3374_s19 = smov %s2434_s20  ;;  %s3375_s20 = smov %s2438_s21 }
 0x42d   : > { %s3376_s21 = smov %s2876_s15  ;;  %s3377_s24 = smov %s2458_s25 }
 0x42e   : > { %s3378_s25 = smov %s2462_s26  ;;  %s3380_s27 = smov %s2474_s29 }
 0x42f   : > { %s3381_s29 = smov %s2675_s12  ;;  %37 = sbr.rel (!%p3206_p9) target bundleno = 31 (0x1f), region = 162 }
 0x430   : > { %s3379_s26 = smov %s3370_s17 }
 0x431   : > { %s3382_s30 = smov %s3372_s1 }
 0x436   :  { %1268 = vsyncpa [#allocation5], 1 }
 0x437   :  { %1270 = vsyncpa [#allocation5 + $0x1], 1 }
 0x438   :  { %1271 = vsyncpa [#allocation8], 1 }
 0x439   :  { %1273 = vsyncpa [#allocation8 + $0x1], 1 }
 0x43a   :  { %1274 = vsyncpa [#allocation11], 1 }
 0x43b   :  { %1276 = vsyncpa [#allocation11 + $0x1], 1 }
 0x43c   :  { %1277 = vsyncpa [#allocation14], 1 }
 0x43d   :  { %1279 = vsyncpa [#allocation14 + $0x1], 1 }
 0x43e   :  { %1280 = vsyncpa [#allocation6], 1 }
 0x43f   :  { %1282 = vsyncpa [#allocation6 + $0x1], 1 }

</bundles_post_ra>
